<compile_context>
chip_gen: v5e
topology: v5e:2x2
jax: 0.10.0
libtpu: 0.0.40
codegen_flags: <defaults>
</compile_context>

<pallas_src>
import functools
import math
import numpy as np
import jax
import jax.numpy as jnp
from jax import lax
from jax.experimental import pallas as pl
from jax.experimental.pallas import tpu as pltpu

# ---- small, module-consistent configuration ---------------------------------
FILTER_LENGTH = 64                  # scaled-down from 1024
N_OVERLAP = 4
HOP_LENGTH = FILTER_LENGTH // N_OVERLAP
WIN_LENGTH = FILTER_LENGTH
CUTOFF = FILTER_LENGTH // 2 + 1     # 33 frequency bins
CHALF = 64                          # imag-bin sublane offset (CUTOFF <= 64)
CPACK = 2 * CHALF                   # 128: one lane-dense spectrum block
STRENGTH = 0.1
TINY = float(np.finfo(np.float32).tiny)


# ---- STFT basis / window helpers (deterministic, numpy) ----------------------
def _hann_periodic(n):
    k = np.arange(n)
    return (0.5 - 0.5 * np.cos(2.0 * np.pi * k / n)).astype(np.float32)


def _pad_center(w, size):
    n = len(w)
    lpad = (size - n) // 2
    out = np.zeros(size, dtype=w.dtype)
    out[lpad:lpad + n] = w
    return out


def make_stft_bases(filter_length=FILTER_LENGTH, hop_length=HOP_LENGTH,
                    win_length=WIN_LENGTH):
    scale = filter_length / hop_length
    fourier_basis = np.fft.fft(np.eye(filter_length))
    cutoff = filter_length // 2 + 1
    fourier_basis = np.vstack([np.real(fourier_basis[:cutoff, :]),
                               np.imag(fourier_basis[:cutoff, :])])
    forward_basis = fourier_basis.astype(np.float32)                             # [2C, F]
    inverse_basis = np.linalg.pinv(scale * fourier_basis).T.astype(np.float32)   # [2C, F]
    fft_window = _pad_center(_hann_periodic(win_length), filter_length)
    forward_basis = forward_basis * fft_window[None, :]
    inverse_basis = inverse_basis * fft_window[None, :]
    return forward_basis, inverse_basis


def window_sumsquare(n_frames, hop_length=HOP_LENGTH, win_length=WIN_LENGTH,
                     n_fft=FILTER_LENGTH):
    n = n_fft + hop_length * (n_frames - 1)
    x = np.zeros(n, dtype=np.float32)
    win_sq = _hann_periodic(win_length) ** 2
    win_sq = _pad_center(win_sq, n_fft)
    for i in range(n_frames):
        s = i * hop_length
        x[s:min(n, s + n_fft)] += win_sq[:max(0, min(n_fft, n - s))]
    return x


def make_kernel_weights(fwd_basis, inv_basis, bias_unscaled):
    """Lane/sublane-packed fused kernel weights (constant, prepared host-side).

    Spectrum packing: real bins at sublanes [0, CUTOFF), imag bins at sublanes
    [CHALF, CHALF+CUTOFF) of one 128-row block.  Frame index sits on the lane
    axis inside the kernel, so weights are stored in the transposed layout.
    """
    # forward: s[c, m] = sum_j wfwd_t[c, j] * frames_t[j, m]
    wfwd_t = np.zeros((CPACK, FILTER_LENGTH), np.float32)          # [128, F]
    wfwd_t[:CUTOFF, :] = fwd_basis[:CUTOFF]                        # real rows
    wfwd_t[CHALF:CHALF + CUTOFF, :] = fwd_basis[CUTOFF:]           # imag rows
    # inverse: out_t[j, m] = sum_c winv_t[j, c] * ri[c, m]
    winv_t = np.zeros((FILTER_LENGTH, CPACK), np.float32)          # [F, 128]
    winv_t[:, :CUTOFF] = inv_basis[:CUTOFF].T
    winv_t[:, CHALF:CHALF + CUTOFF] = inv_basis[CUTOFF:].T
    # bias * strength, replicated into both sublane halves (real & imag rows).
    bias2 = np.zeros((CPACK, 1), np.float32)
    b = np.asarray(bias_unscaled).reshape(-1).astype(np.float32) * STRENGTH
    bias2[:CUTOFF, 0] = b
    bias2[CHALF:CHALF + CUTOFF, 0] = b
    return jnp.asarray(wfwd_t), jnp.asarray(bias2), jnp.asarray(winv_t)


# ---- Pallas kernel: STFT -> denoise -> inverse-basis projection --------------
def _denoise_kernel(frames_ref, wfwd_ref, bias_ref, winv_ref, out_ref):
    fr = frames_ref[...]                                                    # [F, TM]
    # Forward transform; bins (real @ 0.., imag @ 64..) on the sublane axis.
    s = jnp.dot(wfwd_ref[...], fr, preferred_element_type=jnp.float32)     # [128, TM]
    # Swap real/imag halves on the XLU so each row sees its partner.
    r = pltpu.roll(s, shift=CHALF, axis=0)
    sq = s * s + r * r                     # |spec|^2, replicated in both halves
    mag = jnp.sqrt(sq)
    # audio_spec_denoised = clamp(mag - bias_spec * strength, 0); bias pre-scaled.
    den = jnp.maximum(mag - bias_ref[...], 0.0)
    # den*cos(atan2(i,r)) == real * den/mag ; rsqrt runs on the EUP slot.
    # Padded / zero-magnitude bins give den == 0, so the result is 0 either way
    # (matches the atan2(0,0) == 0 convention of the reference).
    scale = den * lax.rsqrt(jnp.maximum(sq, TINY))
    ri = s * scale                                                          # [128, TM]
    # Inverse transform, full K = 128 contraction, lane-dense [F, TM] store.
    out_ref[...] = jnp.dot(winv_ref[...], ri, preferred_element_type=jnp.float32)


def _round_up(x, m):
    return ((x + m - 1) // m) * m


def _choose_tm(M):
    """Frame-tile width on the lane axis (must be a multiple of 128).

    Small M: one (or a few) minimal 128-wide tiles.  M > 128 always yields
    >= 2 grid steps so v7x's two TensorCores both get real work.  Large M:
    bigger tiles amortize the ~0.35us/step pipeline overhead; even TM=2048
    keeps double-buffered in/out blocks at ~2 MiB (far under VMEM on all gens).
    """
    if M >= 8192:
        return 2048
    if M >= 2048:
        return 1024
    if M >= 512:
        return 256
    return 128


def denoise_frames(frames_t, wfwd_t, bias2, winv_t):
    """frames_t: [F, M] (frame index on the lane axis) -> denoised frame
    contributions [F, M] (inverse-basis projection, pre overlap-add)."""
    Fl, M = frames_t.shape
    tm = _choose_tm(M)
    Mp = _round_up(M, tm)
    if Mp != M:
        frames_t = jnp.pad(frames_t, ((0, 0), (0, Mp - M)))
    out = pl.pallas_call(
        _denoise_kernel,
        out_shape=jax.ShapeDtypeStruct((Fl, Mp), jnp.float32),
        grid_spec=pltpu.PrefetchScalarGridSpec(
            num_scalar_prefetch=0,
            grid=(Mp // tm,),
            in_specs=[
                pl.BlockSpec((Fl, tm), lambda i: (0, i)),      # frames (tiled over lanes)
                pl.BlockSpec((CPACK, Fl), lambda i: (0, 0)),   # fused fwd basis (constant)
                pl.BlockSpec((CPACK, 1), lambda i: (0, 0)),    # strength-scaled bias (constant)
                pl.BlockSpec((Fl, CPACK), lambda i: (0, 0)),   # fused inv basis (constant)
            ],
            out_specs=pl.BlockSpec((Fl, tm), lambda i: (0, i)),
        ),
        compiler_params=pltpu.CompilerParams(
            dimension_semantics=("parallel",),     # frame tiles shard across TCs on v7x
            vmem_limit_bytes=32 * 1024 * 1024,     # << 64 MiB v7x physical VMEM
        ),
    )(frames_t, wfwd_t, bias2, winv_t)
    return out[:, :M]


# ---- Denoiser.forward glue ----------------------------------------------------
def denoiser_forward(audio, wfwd_t, bias2, winv_t):
    B, L = audio.shape
    pad = FILTER_LENGTH // 2
    # reflect-pad (matches F.pad(..., mode='reflect') in STFT.transform)
    x = jnp.pad(audio.astype(jnp.float32), ((0, 0), (pad, pad)), mode="reflect")
    Lp = x.shape[1]
    T = (Lp - FILTER_LENGTH) // HOP_LENGTH + 1
    # Framing gather + transpose stay inside the surrounding jit so XLA fuses
    # them with the kernel's input DMA.
    # TODO(synk): for very long audio, fuse framing into the kernel (pl.ANY
    # audio ref + manual DMA of contiguous spans) to avoid materializing the
    # N_OVERLAP=4x expanded frames array in HBM.
    idx = np.arange(T)[:, None] * HOP_LENGTH + np.arange(FILTER_LENGTH)[None, :]
    frames_t = x[:, idx].reshape(B * T, FILTER_LENGTH).T      # [F, B*T]
    M = B * T

    out_t = denoise_frames(frames_t, wfwd_t, bias2, winv_t)   # [F, M]
    out_frames = out_t.T.reshape(B, T, FILTER_LENGTH)

    # conv_transpose1d(stride=hop) == overlap-add of per-frame contributions
    # TODO(synk): for long audio fold this overlap-add into a second small
    # Pallas kernel instead of 4 XLA dynamic-update-slice adds.
    n_out = FILTER_LENGTH + HOP_LENGTH * (T - 1)
    sig = jnp.zeros((B, n_out), jnp.float32)
    for j in range(FILTER_LENGTH // HOP_LENGTH):
        chunk = out_frames[:, :, j * HOP_LENGTH:(j + 1) * HOP_LENGTH]
        chunk = chunk.reshape(B, T * HOP_LENGTH)
        sig = sig.at[:, j * HOP_LENGTH:j * HOP_LENGTH + T * HOP_LENGTH].add(chunk)

    # window-sum-square correction + rescale + trim (STFT.inverse)
    wss = window_sumsquare(T)
    nz = wss > np.finfo(np.float32).tiny
    wss_safe = np.where(nz, wss, 1.0).astype(np.float32)
    sig = jnp.where(jnp.asarray(nz)[None, :],
                    sig / jnp.asarray(wss_safe)[None, :], sig)
    sig = sig * (float(FILTER_LENGTH) / HOP_LENGTH)
    return sig[:, pad:n_out - pad]


# ---- deterministic "bias_spec" buffer -----------------------------------------
def init_bias_spec(key, fwd_basis):
    # TODO(synk): original Denoiser gets bias audio from waveglow.infer(zeros, 0);
    # no checkpoint available, so synthesize deterministic bias audio instead.
    bias_audio = 0.05 * np.asarray(
        jax.random.normal(key, (1, 4 * FILTER_LENGTH), jnp.float32))
    pad = FILTER_LENGTH // 2
    xb = np.pad(bias_audio, ((0, 0), (pad, pad)), mode="reflect")
    frame0 = xb[:, :FILTER_LENGTH]                       # first STFT frame
    spec0 = frame0 @ fwd_basis.T                         # [1, 2C]
    r, im = spec0[:, :CUTOFF], spec0[:, CUTOFF:]
    return np.sqrt(r * r + im * im).astype(np.float32)   # [1, C] == bias_spec[:, :, 0]


# ---- pure numpy reference (same CUDA-path math) -------------------------------
def reference_forward(audio, fwd_basis, inv_basis, bias):
    B, L = audio.shape
    pad = FILTER_LENGTH // 2
    x = np.pad(audio, ((0, 0), (pad, pad)), mode="reflect")
    T = (x.shape[1] - FILTER_LENGTH) // HOP_LENGTH + 1
    idx = np.arange(T)[:, None] * HOP_LENGTH + np.arange(FILTER_LENGTH)[None, :]
    frames = x[:, idx]                              # [B, T, F]
    spec = frames @ fwd_basis.T                     # [B, T, 2C]
    real, imag = spec[..., :CUTOFF], spec[..., CUTOFF:]
    mag = np.sqrt(real ** 2 + imag ** 2)
    phase = np.arctan2(imag, real)
    den = np.maximum(mag - bias.reshape(1, 1, CUTOFF) * STRENGTH, 0.0)
    recomb = np.concatenate([den * np.cos(phase), den * np.sin(phase)], axis=-1)
    contrib = recomb @ inv_basis                    # [B, T, F]
    n_out = FILTER_LENGTH + HOP_LENGTH * (T - 1)
    sig = np.zeros((B, n_out), np.float32)
    for t in range(T):
        sig[:, t * HOP_LENGTH:t * HOP_LENGTH + FILTER_LENGTH] += contrib[:, t]
    wss = window_sumsquare(T)
    nz = wss > np.finfo(np.float32).tiny
    sig[:, nz] /= wss[nz]
    sig *= float(FILTER_LENGTH) / HOP_LENGTH
    return sig[:, pad:n_out - pad]


if __name__ == "__main__":
    key = jax.random.PRNGKey(0)
    k_audio, k_bias = jax.random.split(key)

    fwd_basis, inv_basis = make_stft_bases()                  # [2C, F] each
    bias = init_bias_spec(k_bias, fwd_basis)                  # [1, C] (unscaled)
    wfwd_t, bias2, winv_t = make_kernel_weights(fwd_basis, inv_basis, bias)

    B, L = 2, 256
    audio = jax.random.normal(k_audio, (B, L), jnp.float32)

    fwd = jax.jit(denoiser_forward)
    out = fwd(audio, wfwd_t, bias2, winv_t)
    out = jax.block_until_ready(out)
    assert out.shape == (B, L), out.shape

    ref = reference_forward(np.asarray(audio), fwd_basis, inv_basis, bias)
    np.testing.assert_allclose(np.asarray(out), ref, rtol=5e-3, atol=1e-3)

    print("KERNEL_OK")
</pallas_src>

<mosaic_0001>
module attributes {stable_mosaic.version = 11 : i64} {
  func.func @_denoise_kernel(%arg0: i32, %arg1: memref<64x128xf32, #tpu.memory_space<vmem>>, %arg2: memref<128x64xf32, #tpu.memory_space<vmem>>, %arg3: memref<128x1xf32, #tpu.memory_space<vmem>>, %arg4: memref<64x128xf32, #tpu.memory_space<vmem>>, %arg5: memref<64x128xf32, #tpu.memory_space<vmem>>) attributes {dimension_semantics = [#tpu.dimension_semantics<parallel>], iteration_bounds = array<i64: 1>, scalar_prefetch = 0 : i64, scratch_operands = 0 : i64, tpu.core_type = #tpu.core_type<tc>, window_params = [{transform_indices = @transform_0, window_bounds = array<i64: 64, 128>}, {pipeline_mode = #tpu.pipeline_mode<synchronous>, transform_indices = @transform_1, window_bounds = array<i64: 128, 64>}, {pipeline_mode = #tpu.pipeline_mode<synchronous>, transform_indices = @transform_2, window_bounds = array<i64: 128, 1>}, {pipeline_mode = #tpu.pipeline_mode<synchronous>, transform_indices = @transform_3, window_bounds = array<i64: 64, 128>}, {transform_indices = @transform_4, window_bounds = array<i64: 64, 128>}]} {
    %c0 = arith.constant 0 : index
    %c0_0 = arith.constant 0 : index
    %0 = vector.load %arg1[%c0, %c0_0] : memref<64x128xf32, #tpu.memory_space<vmem>>, vector<64x128xf32>
    %c0_1 = arith.constant 0 : index
    %c0_2 = arith.constant 0 : index
    %1 = vector.load %arg2[%c0_1, %c0_2] : memref<128x64xf32, #tpu.memory_space<vmem>>, vector<128x64xf32>
    %cst = arith.constant dense<0.000000e+00> : vector<128x128xf32>
    %2 = tpu.matmul %1, %0, %cst {dimension_numbers = #tpu.dot_dimension_numbers<[1], [0], [0], [1], [0, 0, 1, 1], [], []>} : vector<128x64xf32>, vector<64x128xf32>, vector<128x128xf32> -> vector<128x128xf32>
    %c64_i32 = arith.constant 64 : i32
    %3 = tpu.dynamic_rotate %2 by %c64_i32 dim 0 : vector<128x128xf32>, i32 -> vector<128x128xf32>
    %4 = arith.mulf %2, %2 : vector<128x128xf32>
    %5 = arith.mulf %3, %3 : vector<128x128xf32>
    %6 = arith.addf %4, %5 : vector<128x128xf32>
    %7 = math.sqrt %6 : vector<128x128xf32>
    %c0_3 = arith.constant 0 : index
    %c0_4 = arith.constant 0 : index
    %8 = vector.load %arg3[%c0_3, %c0_4] : memref<128x1xf32, #tpu.memory_space<vmem>>, vector<128x1xf32>
    %9 = vector.broadcast %8 : vector<128x1xf32> to vector<128x128xf32>
    %10 = arith.subf %7, %9 : vector<128x128xf32>
    %cst_5 = arith.constant 0.000000e+00 : f32
    %11 = vector.broadcast %cst_5 : f32 to vector<128x128xf32>
    %12 = arith.maximumf %10, %11 : vector<128x128xf32>
    %cst_6 = arith.constant 1.17549435E-38 : f32
    %13 = vector.broadcast %cst_6 : f32 to vector<128x128xf32>
    %14 = arith.maximumf %6, %13 : vector<128x128xf32>
    %15 = math.rsqrt %14 : vector<128x128xf32>
    %16 = arith.mulf %12, %15 : vector<128x128xf32>
    %17 = arith.mulf %2, %16 : vector<128x128xf32>
    %c0_7 = arith.constant 0 : index
    %c0_8 = arith.constant 0 : index
    %18 = vector.load %arg4[%c0_7, %c0_8] : memref<64x128xf32, #tpu.memory_space<vmem>>, vector<64x128xf32>
    %cst_9 = arith.constant dense<0.000000e+00> : vector<64x128xf32>
    %19 = tpu.matmul %18, %17, %cst_9 {dimension_numbers = #tpu.dot_dimension_numbers<[1], [0], [0], [1], [0, 0, 1, 1], [], []>} : vector<64x128xf32>, vector<128x128xf32>, vector<64x128xf32> -> vector<64x128xf32>
    %c0_10 = arith.constant 0 : index
    %c0_11 = arith.constant 0 : index
    %20 = vector.load %arg5[%c0_10, %c0_11] : memref<64x128xf32, #tpu.memory_space<vmem>>, vector<64x128xf32>
    tpu.vector_store %arg5[%c0_10, %c0_11], %19 {strides = array<i32>} : memref<64x128xf32, #tpu.memory_space<vmem>>, vector<64x128xf32>,
    return
  }
  func.func @transform_0(%arg0: i32) -> (i32, i32) {
    %c0_i32 = arith.constant 0 : i32
    %c0_i32_0 = arith.constant 0 : i32
    return %c0_i32, %arg0 : i32, i32
  }
  func.func @transform_1(%arg0: i32) -> (i32, i32) {
    %c0_i32 = arith.constant 0 : i32
    %c0_i32_0 = arith.constant 0 : i32
    %c0_i32_1 = arith.constant 0 : i32
    return %c0_i32, %c0_i32_0 : i32, i32
  }
  func.func @transform_2(%arg0: i32) -> (i32, i32) {
    %c0_i32 = arith.constant 0 : i32
    %c0_i32_0 = arith.constant 0 : i32
    %c0_i32_1 = arith.constant 0 : i32
    return %c0_i32, %c0_i32_0 : i32, i32
  }
  func.func @transform_3(%arg0: i32) -> (i32, i32) {
    %c0_i32 = arith.constant 0 : i32
    %c0_i32_0 = arith.constant 0 : i32
    %c0_i32_1 = arith.constant 0 : i32
    return %c0_i32, %c0_i32_0 : i32, i32
  }
  func.func @transform_4(%arg0: i32) -> (i32, i32) {
    %c0_i32 = arith.constant 0 : i32
    %c0_i32_0 = arith.constant 0 : i32
    return %c0_i32, %arg0 : i32, i32
  }
}

</mosaic_0001>

<bundles_post_ra>
// kernel: denoiser_forward.1
= control target key start
LH: loop header
LB: loop body
LE: loop exit
PB: predicated region body
PF: predicated region fallthrough
CT: control target
= control target key end

     0   :  { %v660_v3 = vmov 0   ;;  %vm41_vm0 = vcmask 523264   ;;  %s1235_s0 = inlined_call_operand.vmem [shape: f32[64,128], index: 0, kind: input, shape index: {}]   ;;  %s1236_s2 = inlined_call_operand.vmem [shape: f32[128,1], index: 2, kind: input, shape index: {}]   ;;  %s1237_s1 = inlined_call_operand.vmem [shape: f32[128,64], index: 1, kind: input, shape index: {}]   ;;  %s1238_s3 = inlined_call_operand.vmem [shape: f32[64,128], index: 3, kind: input, shape index: {}]   ;;  %s1239_s4 = inlined_call_operand.vmem [shape: f32[64,128], index: 4, kind: output, shape index: {}]  }
   0x1   :  { %v24_v0 = vld [vmem:[%s1235_s0 + $0x38] sm:$0xff]  ;;  %v23_v1 = vld [vmem:[%s1235_s0 + $0x30] sm:$0xff]  ;;  %v22_v2 = vld [vmem:[%s1235_s0 + $0x28] sm:$0xff]  ;;  %625 = vset.pattern.permute.xlu0 %v660_v3  ;;  %626 = vset.pattern.permute.xlu1 %v660_v3 }
   0x2   :  { %600 = vmatpush.msra.mxu2 %v24_v0  ;;  %98 = vmatpush.msra.mxu0 %v24_v0  ;;  %v290_v4 = vld [vmem:[%s1236_s2 + $0x78] sm:$0xff]  ;;  %v21_v5 = vld [vmem:[%s1235_s0 + $0x20] sm:$0xff]  ;;  %v19_v7 = vld [vmem:[%s1235_s0 + $0x10] sm:$0xff] }
   0x3   :  { %368 = vperm.xlu0 %625, %v290_v4   ;;  %627 = vset.pattern.permute.xlu2 %v660_v3  ;;  %v20_v6 = vld [vmem:[%s1235_s0 + $0x18] sm:$0xff]  ;;  %v289_v8 = vld [vmem:[%s1236_s2 + $0x70] sm:$0xff]  ;;  %v18_v9 = vld [vmem:[%s1235_s0 + $0x8] sm:$0xff] }
   0x4   :  { %601 = vmatpush.msra.mxu2 %v23_v1  ;;  %99 = vmatpush.msra.mxu0 %v23_v1  ;;  %v17_v10 = vld [vmem:[%s1235_s0] sm:$0xff]  ;;  %v31_v11 = vld [vmem:[%s1237_s1 + $0x30] sm:$0xff]  ;;  %v284_v13 = vld [vmem:[%s1236_s2 + $0x48] sm:$0xff] }
   0x5   :  { %v25_v12 = vld [vmem:[%s1237_s1] sm:$0xff]  ;;  %v32_v14 = vld [vmem:[%s1237_s1 + $0x38] sm:$0xff]  ;;  %v26_v15 = vld [vmem:[%s1237_s1 + $0x8] sm:$0xff] }
   0x6   :  { %602 = vmatpush.msra.mxu2 %v22_v2  ;;  %100 = vmatpush.msra.mxu0 %v22_v2  ;;  %v288_v16 = vld [vmem:[%s1236_s2 + $0x68] sm:$0xff]  ;;  %v281_v17 = vld [vmem:[%s1236_s2 + $0x30] sm:$0xff]  ;;  %v33_v18 = vld [vmem:[%s1237_s1 + $0x40] sm:$0xff] }
   0x7   :  { %358 = vperm.xlu1 %626, %v288_v16   ;;  %v27_v19 = vld [vmem:[%s1237_s1 + $0x10] sm:$0xff]  ;;  %v287_v20 = vld [vmem:[%s1236_s2 + $0x60] sm:$0xff]  ;;  %v278_v21 = vld [vmem:[%s1236_s2 + $0x18] sm:$0xff] }
   0x8   :  { %603 = vmatpush.msra.mxu2 %v21_v5  ;;  %101 = vmatpush.msra.mxu0 %v21_v5  ;;  %v34_v22 = vld [vmem:[%s1237_s1 + $0x48] sm:$0xff]  ;;  %v28_v23 = vld [vmem:[%s1237_s1 + $0x18] sm:$0xff]  ;;  %v283_v25 = vld [vmem:[%s1236_s2 + $0x40] sm:$0xff] }
   0x9   :  { %v286_v24 = vld [vmem:[%s1236_s2 + $0x58] sm:$0xff]  ;;  %v275_v26 = vld [vmem:[%s1236_s2] sm:$0xff]  ;;  %v35_v27 = vld [vmem:[%s1237_s1 + $0x50] sm:$0xff] }
   0xa   :  { %604 = vmatpush.msra.mxu2 %v20_v6  ;;  %102 = vmatpush.msra.mxu0 %v20_v6  ;;  %v29_v28 = vld [vmem:[%s1237_s1 + $0x20] sm:$0xff]  ;;  %v285_v29 = vld [vmem:[%s1236_s2 + $0x50] sm:$0xff]  ;;  %v280_v30 = vld [vmem:[%s1236_s2 + $0x28] sm:$0xff] }
   0xb   :  { %363 = vperm.xlu0 %625, %v289_v8   ;;  %348 = vperm.xlu2 %627, %v286_v24   ;;  %v36_v31 = vld [vmem:[%s1237_s1 + $0x58] sm:$0xff]  ;;  %v30_v32 = vld [vmem:[%s1237_s1 + $0x28] sm:$0xff]  ;;  %v277_v34 = vld [vmem:[%s1236_s2 + $0x10] sm:$0xff] }
   0xc   :  { %605 = vmatpush.msra.mxu2 %v19_v7  ;;  %103 = vmatpush.msra.mxu0 %v19_v7  ;;  %v282_v33 = vld [vmem:[%s1236_s2 + $0x38] sm:$0xff]  ;;  %v37_v35 = vld [vmem:[%s1237_s1 + $0x60] sm:$0xff]  ;;  %v38_v37 = vld [vmem:[%s1237_s1 + $0x68] sm:$0xff] }
   0xd   :  { %v279_v36 = vld [vmem:[%s1236_s2 + $0x20] sm:$0xff]  ;;  %v276_v38 = vld [vmem:[%s1236_s2 + $0x8] sm:$0xff]  ;;  %v39_v39 = vld [vmem:[%s1237_s1 + $0x70] sm:$0xff] }
   0xe   :  { %606 = vmatpush.msra.mxu2 %v18_v9  ;;  %104 = vmatpush.msra.mxu0 %v18_v9  ;;  %v40_v40 = vld [vmem:[%s1237_s1 + $0x78] sm:$0xff] }
   0xf   :  { %353 = vperm.xlu1 %626, %v287_v20  }
  0x10   :  { %607 = vmatpush.msra.mxu2 %v17_v10  ;;  %105 = vmatpush.msra.mxu0 %v17_v10 }
  0x11   :  { %590 = vmatmul.msk.f32.vlgmr.msra.gmra.mxu2 %vm41_vm0, %v31_v11  ;;  %584 = vmatmul.msk.f32.vlgmr.msra.gmra.mxu0 %vm41_vm0, %v25_v12 }
  0x13   :  { %338 = vperm.xlu0 %625, %v284_v13   ;;  %343 = vperm.xlu2 %627, %v285_v29  }
  0x17   :  { %333 = vperm.xlu1 %626, %v283_v25  }
  0x19   :  { %591 = vmatmul.msk.f32.gmra.mxu2 %vm41_vm0, %v32_v14  ;;  %585 = vmatmul.msk.f32.gmra.mxu0 %vm41_vm0, %v26_v15 }
  0x1b   :  { %323 = vperm.xlu0 %625, %v281_v17   ;;  %328 = vperm.xlu2 %627, %v282_v33  }
  0x1f   :  { %318 = vperm.xlu1 %626, %v280_v30  }
  0x21   :  { %592 = vmatmul.msk.f32.gmra.mxu2 %vm41_vm0, %v33_v18  ;;  %586 = vmatmul.msk.f32.gmra.mxu0 %vm41_vm0, %v27_v19 }
  0x23   :  { %308 = vperm.xlu0 %625, %v278_v21   ;;  %313 = vperm.xlu2 %627, %v279_v36  }
  0x27   :  { %303 = vperm.xlu1 %626, %v277_v34  }
  0x29   :  { %593 = vmatmul.msk.f32.gmra.mxu2 %vm41_vm0, %v34_v22  ;;  %587 = vmatmul.msk.f32.gmra.mxu0 %vm41_vm0, %v28_v23 }
  0x2b   :  { %293 = vperm.xlu0 %625, %v275_v26   ;;  %298 = vperm.xlu2 %627, %v276_v38  }
  0x31   :  { %594 = vmatmul.msk.f32.gmra.mxu2 %vm41_vm0, %v35_v27  ;;  %588 = vmatmul.msk.f32.gmra.mxu0 %vm41_vm0, %v29_v28 }
  0x39   :  { %595 = vmatmul.msk.f32.gmra.mxu2 %vm41_vm0, %v36_v31  ;;  %589 = vmatmul.msk.f32.gmra.mxu0 %vm41_vm0, %v30_v32 }
  0x41   :  { %596 = vmatmul.msk.f32.gmra.mxu2 %vm41_vm0, %v37_v35 }
  0x49   :  { %597 = vmatmul.msk.f32.gmra.mxu2 %vm41_vm0, %v38_v37 }
  0x51   :  { %598 = vmatmul.msk.f32.gmra.mxu2 %vm41_vm0, %v39_v39 }
  0x59   :  { %599 = vmatmul.msk.f32.gmra.mxu2 %vm41_vm0, %v40_v40 }
  0x75   :  { %v822_v41 = vpop.permute.xlu0 %368 }
  0x7d   :  { %v824_v42 = vpop.permute.xlu0 %363 }
  0x85   :  { %v830_v46 = vpop.permute.xlu0 %338 }
  0x8d   :  { %v838_v52 = vpop.permute.xlu0 %323 }
  0x8e   :  { %v107_v44 = vpop.f32.mrf.mxu0 }
  0x8f   :  { %v155_v48 = vmul.f32 %v107_v44, %v107_v44 }
  0x94   :  { %v826_v43 = vpop.f32.mrf.mxu2 }
  0x95   :  { %1251 = vst [vmem:[#allocation2_spill] sm:$0xff] %v826_v43  ;;  %v844_v58 = vpop.permute.xlu0 %308 }
  0x96   :  { %v832_v47 = vpop.f32.mrf.mxu0  ;;  %1257 = vst [vmem:[#allocation8_spill] sm:$0xff] %v844_v58 }
  0x97   :  { %1253 = vst [vmem:[#allocation4_spill] sm:$0xff] %v832_v47  ;;  %v156_v7 = vmul.f32 %v832_v47, %v832_v47 }
  0x9c   :  { %v828_v45 = vpop.f32.mrf.mxu2 }
  0x9d   :  { %1252 = vst [vmem:[#allocation3_spill] sm:$0xff] %v828_v45  ;;  %v294_v10 = vpop.permute.xlu0 %293 }
  0x9e   :  { %v840_v53 = vpop.f32.mrf.mxu0 }
  0x9f   :  { %1255 = vst [vmem:[#allocation6_spill] sm:$0xff] %v840_v53  ;;  %v157_v18 = vmul.f32 %v840_v53, %v840_v53 }
  0xa4   :  { %v834_v49 = vpop.f32.mrf.mxu2 }
  0xa5   :  { %1254 = vst [vmem:[#allocation5_spill] sm:$0xff] %v834_v49  ;;  %v163_v50 = vmul.f32 %v834_v49, %v834_v49 }
  0xa6   :  { %v848_v63 = vpop.f32.mrf.mxu0 }
  0xa7   :  { %v171_v51 = vadd.f32 %v163_v50, %v155_v48  ;;  %1259 = vst [vmem:[#allocation10_spill] sm:$0xff] %v848_v63  ;;  %v158_v25 = vmul.f32 %v848_v63, %v848_v63 }
  0xa9   :  { %628 = vrsqrt.f32 %v171_v51  ;;  %v403_v54 = vmax.f32 %v171_v51, 1.1754944e-38  ;;  %vm186_vm1 = vcmp.eq.f32.partialorder %v171_v51, inf  ;;  %v189_v9 = vand.u32 2147483648, %v171_v51 }
  0xaa   :  { %vm188_vm2 = vcmp.eq.f32.partialorder %v171_v51, 0.0 }
  0xab   :  { %630 = vrsqrt.f32 %v403_v54  ;;  %vm417_vm4 = vweird.f32 %v403_v54 }
  0xac   :  { %v842_v55 = vpop.f32.mrf.mxu2 }
  0xad   :  { %1256 = vst [vmem:[#allocation7_spill] sm:$0xff] %v842_v55  ;;  %v164_v8 = vmul.f32 %v842_v55, %v842_v55 }
  0xae   :  { %v859_v16 = vpop.f32.mrf.mxu0 }
  0xaf   :  { %v629_v56 = vpop.eup %628  ;;  %1260 = vst [vmem:[#allocation11_spill] sm:$0xff] %v859_v16  ;;  %v861_v17 = vadd.f32 %v164_v8, %v156_v7  ;;  %v159_v27 = vmul.f32 %v859_v16, %v859_v16 }
  0xb0   :  { %v180_v57 = vmul.f32 %v629_v56, %v171_v51 }
  0xb1   :  { %v631_v59 = vpop.eup %630  ;;  %632 = vrsqrt.f32 %v861_v17  ;;  %v896_v36 = vmax.f32 %v861_v17, 1.1754944e-38  ;;  %vm198_vm6 = vcmp.eq.f32.partialorder %v861_v17, inf  ;;  %vm200_vm7 = vcmp.eq.f32.partialorder %v861_v17, 0.0 }
  0xb2   :  { %v181_v60 = vmul.f32 %v629_v56, %v180_v57  ;;  %v412_v61 = vmul.f32 %v631_v59, %v403_v54  ;;  %vm418_vm3 = vweird.f32 %v631_v59 }
  0xb3   :  { %vm419_vm5 = vmor %vm417_vm4, %vm418_vm3 }
  0xb4   :  { %v846_v62 = vpop.f32.mrf.mxu2  ;;  %v182_v0 = vmul.f32 0.5, %v181_v60  ;;  %v413_v1 = vmul.f32 %v631_v59, %v412_v61 }
  0xb5   :  { %1258 = vst [vmem:[#allocation9_spill] sm:$0xff] %v846_v62  ;;  %v165_v19 = vmul.f32 %v846_v62, %v846_v62 }
  0xb6   :  { %v183_v2 = vsub.f32 1.5, %v182_v0  ;;  %v414_v3 = vmul.f32 0.5, %v413_v1  ;;  %v885_v30 = vpop.f32.mrf.mxu0 }
  0xb7   :  { %v871_v23 = vadd.f32 %v165_v19, %v157_v18  ;;  %1262 = vst [vmem:[#allocation13_spill] sm:$0xff] %v885_v30  ;;  %v633_v31 = vpop.eup %632  ;;  %v160_v34 = vmul.f32 %v885_v30, %v885_v30 }
  0xb8   :  { %v184_v4 = vmul.f32 %v629_v56, %v183_v2  ;;  %v415_v6 = vsub.f32 1.5, %v414_v3  ;;  %v192_v35 = vmul.f32 %v633_v31, %v861_v17 }
  0xb9   :  { %634 = vrsqrt.f32 %v871_v23  ;;  %v903_v40 = vmax.f32 %v871_v23, 1.1754944e-38  ;;  %vm210_vm8 = vcmp.eq.f32.partialorder %v871_v23, inf  ;;  %vm212_vm10 = vcmp.eq.f32.partialorder %v871_v23, 0.0 }
  0xba   :  { %v185_v5 = vmul.f32 %v184_v4, %v171_v51  ;;  %v416_v14 = vmul.f32 %v631_v59, %v415_v6  ;;  %v193_v48 = vmul.f32 %v633_v31, %v192_v35 }
  0xbc   :  { %v854_v11 = vpop.f32.mrf.mxu2  ;;  %v187_v12 = vsel %vm186_vm1, %v171_v51, %v185_v5  ;;  %v867_v21 = vsel %vm419_vm5, %v631_v59, %v416_v14  ;;  %v194_v54 = vmul.f32 0.5, %v193_v48  ;;  %v161_v59 = vmul.f32 %v826_v43, %v826_v43 }
  0xbd   :  { %v856_v13 = vsel %vm188_vm2, %v189_v9, %v187_v12  ;;  %v166_v26 = vmul.f32 %v854_v11, %v854_v11 }
  0xbe   :  { %v371_v15 = vsub.f32 %v856_v13, %v294_v10  ;;  %v195_v6 = vsub.f32 1.5, %v194_v54 }
  0xbf   :  { %v888_v32 = vadd.f32 %v166_v26, %v158_v25  ;;  %v635_v39 = vpop.eup %634 }
  0xc0   :  { %v387_v20 = vmax.f32 %v371_v15, 0.0  ;;  %v204_v50 = vmul.f32 %v635_v39, %v871_v23  ;;  %v196_v25 = vmul.f32 %v633_v31, %v195_v6 }
  0xc1   :  { %636 = vrsqrt.f32 %v888_v32  ;;  %v932_v4 = vmax.f32 %v888_v32, 1.1754944e-38  ;;  %vm222_vm9 = vcmp.eq.f32.partialorder %v888_v32, inf  ;;  %vm224_vm12 = vcmp.eq.f32.partialorder %v888_v32, 0.0 }
  0xc2   :  { %v491_v22 = vmul.f32 %v867_v21, %v387_v20  ;;  %v205_v60 = vmul.f32 %v635_v39, %v204_v50  ;;  %v968_v50 = vpop.permute.xlu1 %358 }
  0xc4   :  { %v873_v24 = vpop.f32.mrf.mxu2  ;;  %v883_v29 = vmul.f32 %v491_v22, %v107_v44  ;;  %v206_v10 = vmul.f32 0.5, %v205_v60  ;;  %v162_v22 = vmul.f32 %v828_v45, %v828_v45  ;;  %v197_v60 = vmul.f32 %v196_v25, %v861_v17 }
  0xc5   :  { %v167_v28 = vmul.f32 %v873_v24, %v873_v24 }
  0xc6   :  { %1261 = vst [vmem:[#allocation12_spill] sm:$0xff] %v883_v29 }
  0xc7   :  { %v890_v33 = vadd.f32 %v167_v28, %v159_v27  ;;  %v913_v51 = vpop.eup %636 }
  0xc8   :  { %v216_v3 = vmul.f32 %v913_v51, %v888_v32 }
  0xc9   :  { %638 = vrsqrt.f32 %v890_v33  ;;  %v944_v12 = vmax.f32 %v890_v33, 1.1754944e-38  ;;  %vm234_vm11 = vcmp.eq.f32.partialorder %v890_v33, inf  ;;  %vm236_vm13 = vcmp.eq.f32.partialorder %v890_v33, 0.0 }
  0xca   :  { %640 = vrsqrt.f32 %v896_v36  ;;  %v217_v20 = vmul.f32 %v913_v51, %v216_v3  ;;  %v1025_v43 = vpop.permute.xlu1 %353 }
  0xcc   :  { %v898_v37 = vpop.f32.mrf.mxu2 }
  0xcd   :  { %v168_v38 = vmul.f32 %v898_v37, %v898_v37 }
  0xcf   :  { %v906_v44 = vadd.f32 %v168_v38, %v160_v34  ;;  %v917_v57 = vpop.eup %638  ;;  %v207_v34 = vsub.f32 1.5, %v206_v10 }
  0xd0   :  { %v923_v0 = vpop.eup %640  ;;  %v228_v8 = vmul.f32 %v917_v57, %v890_v33 }
  0xd1   :  { %642 = vrsqrt.f32 %v906_v44  ;;  %v422_v9 = vmul.f32 %v923_v0, %v896_v36  ;;  %v951_v18 = vmax.f32 %v906_v44, 1.1754944e-38  ;;  %vm246_vm15 = vcmp.eq.f32.partialorder %v906_v44, inf }
  0xd2   :  { %644 = vrsqrt.f32 %v903_v40  ;;  %v229_v27 = vmul.f32 %v917_v57, %v228_v8  ;;  %v249_v58 = vand.u32 2147483648, %v906_v44  ;;  %vm248_vm1 = vcmp.eq.f32.partialorder %v906_v44, 0.0 }
  0xd3   :  { %v423_v28 = vmul.f32 %v923_v0, %v422_v9  ;;  %v208_v9 = vmul.f32 %v635_v39, %v207_v34 }
  0xd4   :  { %v915_v56 = vpop.f32.mrf.mxu2  ;;  %v230_v3 = vmul.f32 0.5, %v229_v27  ;;  %v213_v27 = vand.u32 2147483648, %v871_v23 }
  0xd5   :  { %v169_v61 = vmul.f32 %v915_v56, %v915_v56  ;;  %v981_v8 = vmul.f32 0.5, %v423_v28  ;;  %v209_v47 = vmul.f32 %v208_v9, %v871_v23 }
  0xd7   :  { %v925_v1 = vpop.eup %642  ;;  %v927_v2 = vadd.f32 %v169_v61, %v161_v59  ;;  %v218_v59 = vmul.f32 0.5, %v217_v20 }
  0xd8   :  { %v934_v5 = vpop.eup %644  ;;  %v240_v7 = vmul.f32 %v925_v1, %v906_v44 }
  0xd9   :  { %646 = vrsqrt.f32 %v927_v2  ;;  %v947_v14 = vmax.f32 %v927_v2, 1.1754944e-38  ;;  %v432_v19 = vmul.f32 %v934_v5, %v903_v40  ;;  %v219_v39 = vsub.f32 1.5, %v218_v59 }
  0xda   :  { %v241_v15 = vmul.f32 %v925_v1, %v240_v7  ;;  %648 = vrsqrt.f32 %v932_v4  ;;  %v978_v7 = vpop.permute.xlu2 %348  ;;  %vm258_vm14 = vcmp.eq.f32.partialorder %v927_v2, inf  ;;  %v261_v45 = vand.u32 2147483648, %v927_v2 }
  0xdb   :  { %650 = vrsqrt.f32 %v947_v14  ;;  %v433_v31 = vmul.f32 %v934_v5, %v432_v19  ;;  %vm260_vm0 = vcmp.eq.f32.partialorder %v927_v2, 0.0 }
  0xdc   :  { %v959_v26 = vpop.f32.mrf.mxu2  ;;  %652 = vrsqrt.f32 %v944_v12  ;;  %v242_v38 = vmul.f32 0.5, %v241_v15  ;;  %v201_v15 = vand.u32 2147483648, %v861_v17 }
  0xdd   :  { %v170_v35 = vmul.f32 %v959_v26, %v959_v26  ;;  %654 = vrsqrt.f32 %v951_v18  ;;  %v994_v28 = vmul.f32 0.5, %v433_v31 }
  0xdf   :  { %v647_v48 = vpop.eup %646  ;;  %v971_v54 = vadd.f32 %v170_v35, %v162_v22  ;;  %v243_v22 = vsub.f32 1.5, %v242_v38  ;;  %v199_v35 = vsel %vm198_vm6, %v861_v17, %v197_v60  ;;  %v211_v17 = vsel %vm210_vm8, %v871_v23, %v209_v47 }
  0xe0   :  { %v252_v61 = vmul.f32 %v647_v48, %v927_v2  ;;  %v976_v6 = vpop.eup %648  ;;  %v1015_v9 = vsel %vm200_vm7, %v201_v15, %v199_v35  ;;  %v237_v35 = vand.u32 2147483648, %v890_v33  ;;  %vm477_vm6 = vweird.f32 %v947_v14 }
  0xe1   :  { %656 = vrsqrt.f32 %v971_v54  ;;  %v984_v10 = vpop.eup %650  ;;  %v988_v19 = vmax.f32 %v971_v54, 1.1754944e-38  ;;  %v442_v31 = vmul.f32 %v976_v6, %v932_v4  ;;  %v244_v63 = vmul.f32 %v925_v1, %v243_v22 }
  0xe2   :  { %v253_v20 = vmul.f32 %v647_v48, %v252_v61  ;;  %v990_v25 = vpop.eup %652  ;;  %v231_v61 = vsub.f32 1.5, %v230_v3  ;;  %v472_v53 = vmul.f32 %v984_v10, %v947_v14  ;;  %v225_v3 = vand.u32 2147483648, %v888_v32  ;;  %v1040_v47 = vpop.permute.xlu2 %343 }
  0xe3   :  { %v996_v34 = vpop.eup %654  ;;  %658 = vrsqrt.f32 %v988_v19  ;;  %v452_v60 = vmul.f32 %v990_v25, %v944_v12  ;;  %v220_v1 = vmul.f32 %v913_v51, %v219_v39  ;;  %v443_v51 = vmul.f32 %v976_v6, %v442_v31 }
  0xe4   :  { %v254_v29 = vmul.f32 0.5, %v253_v20  ;;  %v232_v30 = vmul.f32 %v917_v57, %v231_v61  ;;  %v473_v15 = vmul.f32 %v984_v10, %v472_v53  ;;  %v245_v61 = vmul.f32 %v244_v63, %v906_v44 }
  0xe5   :  { %v221_v38 = vmul.f32 %v220_v1, %v888_v32  ;;  %vm270_vm2 = vcmp.eq.f32.partialorder %v971_v54, inf  ;;  %vm272_vm3 = vcmp.eq.f32.partialorder %v971_v54, 0.0  ;;  %vm478_vm4 = vweird.f32 %v984_v10 }
  0xe6   :  { %v255_v59 = vsub.f32 1.5, %v254_v29  ;;  %v462_v29 = vmul.f32 %v996_v34, %v951_v18  ;;  %v233_v63 = vmul.f32 %v232_v30, %v890_v33  ;;  %v474_v49 = vmul.f32 0.5, %v473_v15  ;;  %vm479_vm8 = vmor %vm477_vm6, %vm478_vm4 }
  0xe7   :  { %v657_v20 = vpop.eup %656  ;;  %v223_v30 = vsel %vm222_vm9, %v888_v32, %v221_v38  ;;  %vm487_vm7 = vweird.f32 %v988_v19  ;;  %vm468_vm9 = vweird.f32 %v996_v34  ;;  %vm428_vm4 = vweird.f32 %v923_v0 }
  0xe8   :  { %v264_v22 = vmul.f32 %v657_v20, %v971_v54  ;;  %v256_v16 = vmul.f32 %v647_v48, %v255_v59  ;;  %v453_v59 = vmul.f32 %v990_v25, %v452_v60  ;;  %v463_v31 = vmul.f32 %v996_v34, %v462_v29 }
  0xe9   :  { %v1034_v39 = vpop.eup %658  ;;  %v247_v29 = vsel %vm246_vm15, %v906_v44, %v245_v61  ;;  %v1077_v44 = vpop.permute.xlu1 %333  ;;  %vm448_vm15 = vweird.f32 %v976_v6 }
  0xea   :  { %v265_v48 = vmul.f32 %v657_v20, %v264_v22  ;;  %v257_v57 = vmul.f32 %v256_v16, %v927_v2  ;;  %v482_v53 = vmul.f32 %v1034_v39, %v988_v19  ;;  %v454_v1 = vmul.f32 0.5, %v453_v59  ;;  %v1090_v32 = vpop.permute.xlu2 %328 }
  0xeb   :  { %v475_v59 = vsub.f32 1.5, %v474_v49  ;;  %vm488_vm5 = vweird.f32 %v1034_v39 }
  0xec   :  { %v266_v22 = vmul.f32 0.5, %v265_v48  ;;  %v259_v16 = vsel %vm258_vm14, %v927_v2, %v257_v57  ;;  %v483_v60 = vmul.f32 %v1034_v39, %v482_v53  ;;  %v464_v57 = vmul.f32 0.5, %v463_v31 }
  0xed   :  { %v1055_v62 = vsel %vm260_vm0, %v261_v45, %v259_v16  ;;  %v1062_v53 = vsel %vm212_vm10, %v213_v27, %v211_v17  ;;  %v235_v2 = vsel %vm234_vm11, %v890_v33, %v233_v63  ;;  %v1068_v45 = vsel %vm248_vm1, %v249_v58, %v247_v29  ;;  %vm489_vm10 = vmor %vm487_vm7, %vm488_vm5 }
  0xee   :  { %v267_v55 = vsub.f32 1.5, %v266_v22  ;;  %v484_v48 = vmul.f32 0.5, %v483_v60  ;;  %v444_v31 = vmul.f32 0.5, %v443_v51  ;;  %v385_v38 = vsub.f32 %v1055_v62, %v824_v42 }
  0xef   :  { %v455_v23 = vsub.f32 1.5, %v454_v1  ;;  %v273_v27 = vand.u32 2147483648, %v971_v54  ;;  %v465_v49 = vsub.f32 1.5, %v464_v57  ;;  %v1083_v58 = vsel %vm236_vm13, %v237_v35, %v235_v2 }
  0xf0   :  { %v268_v15 = vmul.f32 %v657_v20, %v267_v55  ;;  %v485_v61 = vsub.f32 1.5, %v484_v48  ;;  %v1075_v55 = vsel %vm224_vm12, %v225_v3, %v223_v30  ;;  %v384_v42 = vsub.f32 %v1068_v45, %v968_v50 }
  0xf1   :  { %v476_v33 = vmul.f32 %v984_v10, %v475_v59  ;;  %v401_v51 = vmax.f32 %v385_v38, 0.0  ;;  %v466_v50 = vmul.f32 %v996_v34, %v465_v49  ;;  %v445_v16 = vsub.f32 1.5, %v444_v31 }
  0xf2   :  { %v269_v22 = vmul.f32 %v268_v15, %v971_v54  ;;  %v486_v17 = vmul.f32 %v1034_v39, %v485_v61  ;;  %v400_v60 = vmax.f32 %v384_v42, 0.0  ;;  %vm458_vm11 = vweird.f32 %v990_v25  ;;  %v319_v15 = vpop.permute.xlu1 %318  ;;  %v1265_v42 = vld [vmem:[#allocation9_spill] sm:$0xff] }
  0xf3   :  { %vm467_vm12 = vweird.f32 %v951_v18  ;;  %v456_v19 = vmul.f32 %v990_v25, %v455_v23  ;;  %v381_v29 = vsub.f32 %v1062_v53, %v1040_v47  ;;  %vm457_vm14 = vweird.f32 %v944_v12 }
  0xf4   :  { %v271_v20 = vsel %vm270_vm2, %v971_v54, %v269_v22  ;;  %v383_v54 = vsub.f32 %v1083_v58, %v1025_v43  ;;  %v1109_v14 = vsel %vm489_vm10, %v1034_v39, %v486_v17  ;;  %v1112_v43 = vsel %vm479_vm8, %v984_v10, %v476_v33  ;;  %vm469_vm13 = vmor %vm467_vm12, %vm468_vm9  ;;  %v1267_v33 = vld [vmem:[#allocation8_spill] sm:$0xff] }
  0xf5   :  { %v1092_v3 = vsel %vm272_vm3, %v273_v27, %v271_v20  ;;  %v505_v48 = vmul.f32 %v1112_v43, %v401_v51  ;;  %v446_v10 = vmul.f32 %v976_v6, %v445_v16  ;;  %v380_v18 = vsub.f32 %v1015_v9, %v830_v46  ;;  %vm459_vm0 = vmor %vm457_vm14, %vm458_vm11  ;;  %v1268_v51 = vld [vmem:[#allocation5_spill] sm:$0xff] }
  0xf6   :  { %v386_v35 = vsub.f32 %v1092_v3, %v822_v41  ;;  %v382_v41 = vsub.f32 %v1075_v55, %v978_v7  ;;  %v399_v57 = vmax.f32 %v383_v54, 0.0  ;;  %v1121_v7 = vsel %vm469_vm13, %v996_v34, %v466_v50 }
  0xf7   :  { %v504_v47 = vmul.f32 %v1121_v7, %v400_v60  ;;  %v1263_v34 = vsub.f32 1.5, %v994_v28  ;;  %vm438_vm1 = vweird.f32 %v934_v5  ;;  %v1137_v2 = vsel %vm459_vm0, %v990_v25, %v456_v19  ;;  %v314_v28 = vpop.permute.xlu2 %313 }
  0xf8   :  { %v402_v63 = vmax.f32 %v386_v35, 0.0  ;;  %v398_v30 = vmax.f32 %v382_v41, 0.0  ;;  %vm447_vm2 = vweird.f32 %v932_v4  ;;  %v379_v46 = vsub.f32 %v856_v13, %v1077_v44 }
  0xf9   :  { %v436_v12 = vmul.f32 %v934_v5, %v1263_v34  ;;  %v521_v61 = vmul.f32 %v505_v48, %v915_v56  ;;  %v503_v59 = vmul.f32 %v1137_v2, %v399_v57  ;;  %vm449_vm3 = vmor %vm447_vm2, %vm448_vm15  ;;  %v1264_v31 = vsub.f32 1.5, %v981_v8  ;;  %v1275_v34 = vld [vmem:[#allocation4_spill] sm:$0xff] }
  0xfa   :  { %v506_v1 = vmul.f32 %v1109_v14, %v402_v63  ;;  %vm437_vm5 = vweird.f32 %v903_v40  ;;  %v450_v13 = vsel %vm449_vm3, %v976_v6, %v446_v10  ;;  %v396_v4 = vmax.f32 %v380_v18, 0.0  ;;  %v1269_v63 = vld [vmem:[#allocation3_spill] sm:$0xff] }
  0xfb   :  { %v426_v25 = vmul.f32 %v923_v0, %v1264_v31  ;;  %vm439_vm6 = vmor %vm437_vm5, %vm438_vm1  ;;  %v520_v56 = vmul.f32 %v504_v47, %v898_v37  ;;  %v502_v22 = vmul.f32 %v450_v13, %v398_v30  ;;  %v378_v8 = vsub.f32 %v1092_v3, %v1090_v32  ;;  %v1272_v10 = vld [vmem:[#allocation11_spill] sm:$0xff]  ;;  %v1274_v30 = vld [vmem:[#allocation6_spill] sm:$0xff] }
  0xfc   :  { %v522_v39 = vmul.f32 %v506_v1, %v959_v26  ;;  %v397_v26 = vmax.f32 %v381_v29, 0.0  ;;  %vm427_vm7 = vweird.f32 %v896_v36  ;;  %v440_v38 = vsel %vm439_vm6, %v934_v5, %v436_v12  ;;  %v530_v31 = vld [vmem:[%s1238_s3 + $0x38] sm:$0xff] }
  0xfd   :  { %v395_v23 = vmax.f32 %v379_v46, 0.0  ;;  %vm429_vm8 = vmor %vm427_vm7, %vm428_vm4  ;;  %v519_v40 = vmul.f32 %v503_v59, %v873_v24  ;;  %v377_v44 = vsub.f32 %v1055_v62, %v838_v52  ;;  %v518_v27 = vmul.f32 %v502_v22, %v854_v11  ;;  %v304_v52 = vpop.permute.xlu1 %303  ;;  %v1266_v62 = vld [vmem:[#allocation7_spill] sm:$0xff]  ;;  %v529_v59 = vld [vmem:[%s1238_s3 + $0x30] sm:$0xff] }
  0xfe   :  { %531 = vmatpush.msra.mxu1 %v522_v39  ;;  %608 = vmatpush.msra.mxu3 %v522_v39  ;;  %v501_v6 = vmul.f32 %v440_v38, %v397_v26  ;;  %v430_v37 = vsel %vm429_vm8, %v923_v0, %v426_v25  ;;  %v394_v36 = vmax.f32 %v378_v8, 0.0  ;;  %v376_v5 = vsub.f32 %v1068_v45, %v319_v15  ;;  %v1273_v39 = vld [vmem:[#allocation10_spill] sm:$0xff]  ;;  %v528_v46 = vld [vmem:[%s1238_s3 + $0x28] sm:$0xff]  ;;  %v1276_v26 = vld [vmem:[#allocation12_spill] sm:$0xff] }
  0xff   :  { %v500_v49 = vmul.f32 %v430_v37, %v396_v4  ;;  %v499_v20 = vmul.f32 %v867_v21, %v395_v23  ;;  %v393_v32 = vmax.f32 %v377_v44, 0.0  ;;  %v375_v3 = vsub.f32 %v1083_v58, %v314_v28  ;;  %v299_v35 = vpop.permute.xlu2 %298  ;;  %v525_v28 = vld [vmem:[%s1238_s3 + $0x10] sm:$0xff]  ;;  %v526_v25 = vld [vmem:[%s1238_s3 + $0x18] sm:$0xff] }
 0x100   :  { %532 = vmatpush.msra.mxu1 %v521_v61  ;;  %609 = vmatpush.msra.mxu3 %v521_v61  ;;  %v517_v24 = vmul.f32 %v501_v6, %v1265_v42  ;;  %v498_v11 = vmul.f32 %v1109_v14, %v394_v36  ;;  %v392_v17 = vmax.f32 %v376_v5, 0.0  ;;  %v374_v45 = vsub.f32 %v1075_v55, %v1267_v33  ;;  %v524_v61 = vld [vmem:[%s1238_s3 + $0x8] sm:$0xff] }
 0x101   :  { %v516_v0 = vmul.f32 %v500_v49, %v1266_v62  ;;  %v373_v21 = vsub.f32 %v1062_v53, %v304_v52  ;;  %v515_v54 = vmul.f32 %v499_v20, %v1268_v51  ;;  %v497_v58 = vmul.f32 %v1112_v43, %v393_v32  ;;  %v1270_v53 = vld [vmem:[#allocation2_spill] sm:$0xff]  ;;  %v1271_v43 = vld [vmem:[#allocation13_spill] sm:$0xff] }
 0x102   :  { %533 = vmatpush.msra.mxu1 %v520_v56  ;;  %610 = vmatpush.msra.mxu3 %v520_v56  ;;  %v391_v50 = vmax.f32 %v375_v3, 0.0  ;;  %v372_v16 = vsub.f32 %v1015_v9, %v299_v35  ;;  %v514_v60 = vmul.f32 %v498_v11, %v1269_v63  ;;  %v496_v41 = vmul.f32 %v1121_v7, %v392_v17 }
 0x103   :  { %v390_v14 = vmax.f32 %v374_v45, 0.0  ;;  %v389_v55 = vmax.f32 %v373_v21, 0.0  ;;  %v513_v19 = vmul.f32 %v497_v58, %v1270_v53 }
 0x104   :  { %534 = vmatpush.msra.mxu1 %v519_v40  ;;  %611 = vmatpush.msra.mxu3 %v519_v40  ;;  %v495_v29 = vmul.f32 %v1137_v2, %v391_v50  ;;  %v388_v1 = vmax.f32 %v372_v16, 0.0  ;;  %v512_v48 = vmul.f32 %v496_v41, %v1271_v43  ;;  %v523_v2 = vld [vmem:[%s1238_s3] sm:$0xff] }
 0x105   :  { %v494_v9 = vmul.f32 %v450_v13, %v390_v14  ;;  %v493_v57 = vmul.f32 %v440_v38, %v389_v55  ;;  %v527_v13 = vld [vmem:[%s1238_s3 + $0x20] sm:$0xff] }
 0x106   :  { %535 = vmatpush.msra.mxu1 %v518_v27  ;;  %612 = vmatpush.msra.mxu3 %v518_v27  ;;  %v511_v18 = vmul.f32 %v495_v29, %v1272_v10  ;;  %v492_v7 = vmul.f32 %v430_v37, %v388_v1 }
 0x107   :  { %v510_v47 = vmul.f32 %v494_v9, %v1273_v39  ;;  %v509_v15 = vmul.f32 %v493_v57, %v1274_v30 }
 0x108   :  { %536 = vmatpush.msra.mxu1 %v517_v24  ;;  %613 = vmatpush.msra.mxu3 %v517_v24  ;;  %v508_v12 = vmul.f32 %v492_v7, %v1275_v34 }
 0x10a   :  { %537 = vmatpush.msra.mxu1 %v516_v0  ;;  %614 = vmatpush.msra.mxu3 %v516_v0 }
 0x10c   :  { %538 = vmatpush.msra.mxu1 %v515_v54  ;;  %615 = vmatpush.msra.mxu3 %v515_v54 }
 0x10e   :  { %539 = vmatpush.msra.mxu1 %v514_v60  ;;  %616 = vmatpush.msra.mxu3 %v514_v60 }
 0x110   :  { %540 = vmatpush.msra.mxu1 %v513_v19  ;;  %617 = vmatpush.msra.mxu3 %v513_v19 }
 0x112   :  { %541 = vmatpush.msra.mxu1 %v512_v48  ;;  %618 = vmatpush.msra.mxu3 %v512_v48 }
 0x114   :  { %542 = vmatpush.msra.mxu1 %v511_v18  ;;  %619 = vmatpush.msra.mxu3 %v511_v18 }
 0x116   :  { %543 = vmatpush.msra.mxu1 %v510_v47  ;;  %620 = vmatpush.msra.mxu3 %v510_v47 }
 0x118   :  { %544 = vmatpush.msra.mxu1 %v509_v15  ;;  %621 = vmatpush.msra.mxu3 %v509_v15 }
 0x11a   :  { %545 = vmatpush.msra.mxu1 %v508_v12  ;;  %622 = vmatpush.msra.mxu3 %v508_v12 }
 0x11c   :  { %546 = vmatpush.msra.mxu1 %v1276_v26  ;;  %623 = vmatpush.msra.mxu3 %v1276_v26 }
 0x11d   :  { %547 = vmatmul.f32.vlgmr.msra.gmra.mxu1 %v523_v2  ;;  %562 = vmatmul.f32.vlgmr.msra.gmra.mxu3 %v528_v46 }
 0x125   :  { %550 = vmatmul.f32.gmra.mxu1 %v524_v61  ;;  %565 = vmatmul.f32.gmra.mxu3 %v529_v59 }
 0x12d   :  { %553 = vmatmul.f32.gmra.mxu1 %v525_v28  ;;  %568 = vmatmul.f32.gmra.mxu3 %v530_v31 }
 0x135   :  { %556 = vmatmul.f32.gmra.mxu1 %v526_v25 }
 0x13d   :  { %559 = vmatmul.f32.gmra.mxu1 %v527_v13 }
 0x19a   :  { %v548_v4 = vpop.f32.mrf.mxu1 }
 0x19b   :  { %572 = vst [vmem:[%s1239_s4] sm:$0xff] %v548_v4 }
 0x1a0   :  { %v563_v56 = vpop.f32.mrf.mxu3 }
 0x1a1   :  { %577 = vst [vmem:[%s1239_s4 + $0x28] sm:$0xff] %v563_v56 }
 0x1a2   :  { %v551_v22 = vpop.f32.mrf.mxu1 }
 0x1a3   :  { %573 = vst [vmem:[%s1239_s4 + $0x8] sm:$0xff] %v551_v22 }
 0x1a8   :  { %v566_v8 = vpop.f32.mrf.mxu3 }
 0x1a9   :  { %578 = vst [vmem:[%s1239_s4 + $0x30] sm:$0xff] %v566_v8 }
 0x1aa   :  { %v554_v38 = vpop.f32.mrf.mxu1 }
 0x1ab   :  { %574 = vst [vmem:[%s1239_s4 + $0x10] sm:$0xff] %v554_v38 }
 0x1b0   :  { %v569_v23 = vpop.f32.mrf.mxu3 }
 0x1b1   :  { %579 = vst [vmem:[%s1239_s4 + $0x38] sm:$0xff] %v569_v23 }
 0x1b2   :  { %v557_v40 = vpop.f32.mrf.mxu1 }
 0x1b3   :  { %575 = vst [vmem:[%s1239_s4 + $0x18] sm:$0xff] %v557_v40 }
 0x1ba   :  { %v560_v6 = vpop.f32.mrf.mxu1 }
 0x1bb   :  { %576 = vst [vmem:[%s1239_s4 + $0x20] sm:$0xff] %v560_v6 }

</bundles_post_ra>
